<compile_context>
chip_gen: v5e
topology: v5e:2x2
jax: 0.10.0
libtpu: 0.0.40
codegen_flags: <defaults>
</compile_context>

<pallas_src>
import math

import jax
import jax.numpy as jnp
import numpy as np
from jax.experimental import pallas as pl
from jax.experimental.pallas import tpu as pltpu

# log(float32(1e-45)), used only by the pure-JAX reference (the kernel drops this term
# because log_softmax is shift-invariant).
_MASK_LOG = float(np.log(np.float32(1e-45)))

_C = 2          # real number of classes
_C_PAD = 128    # lane-padded class dim for the second matmul (padded columns are inert zeros)


def _round_up(x, m):
    return ((x + m - 1) // m) * m


def _node_predictor_kernel(x_ref, m_ref, w1_ref, b1_ref, w2_ref, b2_ref, o_ref):
    # In-kernel activation cast (no wrapper-side astype pass over HBM); no-op for f32.
    x = x_ref[...].astype(w1_ref.dtype)

    # Hidden layer: Linear -> ReLU (Dropout is identity at inference); f32 MXU accumulation.
    h = jnp.dot(x, w1_ref[...], preferred_element_type=jnp.float32) + b1_ref[...]
    h = jnp.maximum(h, 0.0)

    # Output layer on the lane-padded class dim (real classes in columns 0..1; padded
    # columns have zero weights and zero bias and never enter the 2-class lse below).
    logits = jnp.dot(h.astype(w2_ref.dtype), w2_ref[...],
                     preferred_element_type=jnp.float32) + b2_ref[...]        # (TM, 128)

    # Go class-major with a single native XLU transpose; everything below is 2 x TM wide.
    lt = logits.T                                                             # (128, TM)
    l0 = lt[0:1, :]
    l1 = lt[1:2, :]
    mx = jnp.maximum(l0, l1)
    lse = mx + jnp.log(1.0 + jnp.exp(-jnp.abs(l0 - l1)))                      # (1, TM)

    # 2-class log-softmax + replace_masked_values(.., mask, 0); mask is class-major (1, TM).
    m = m_ref[...]
    o_ref[...] = ((lt[0:_C, :] - lse) * m).astype(o_ref.dtype)                # (2, TM)


def _choose_tile_m(M, tile_m):
    """Row-tile size.  The class-major output makes tile_m the lane dim of the output
    block, so tile_m must be a multiple of 128 unless the whole problem is one block.
    Also clamp so the grid has >= 2 steps when possible (v7x megacore)."""
    if M <= 128:
        return M                                            # single full-extent block
    tile_m = max(128, (min(int(tile_m), M) // 128) * 128)   # 128-multiple (also covers bf16's 16-row packing)
    two_step_cap = max(128, _round_up(pl.cdiv(M, 2), 128))  # >= 2 grid steps (2 TCs on v7x)
    return min(tile_m, two_step_cap)


def _derive_vmem_limit(tile_m, H, weight_bytes):
    """VMEM budget derived from the actual buffers (conservatively assumes double-buffered
    weights in case the Buffered(1) request is ignored), with 1.5x headroom."""
    f32 = 4
    x_tiles = 2 * tile_m * H * f32                      # double-buffered f32 input tile
    m_tiles = 2 * tile_m * f32                          # mask tile
    o_tiles = 2 * 8 * tile_m * f32                      # (2, TM) block, 8-sublane padded
    weights = 2 * (H * H + H * _C_PAD) * weight_bytes + 2 * (H + _C_PAD) * f32
    interm = tile_m * H * f32 + 2 * tile_m * _C_PAD * f32   # h + logits + logits.T
    total = x_tiles + m_tiles + o_tiles + weights + interm
    return int(min(max(total * 3 // 2, 16 * 2**20), 48 * 2**20))   # cap under v7x 64 MiB


def node_predictor_forward(input_vec, node_mask, params, *, tile_m=1024, use_bf16=True):
    """input_vec: (B, N, H) f32; node_mask: (B, N) f32 (0/1). Returns (B, N, 2) f32.

    tile_m: rows per grid step (sweep 512/1024/2048 on real shapes; clamped automatically).
    use_bf16: bf16 MXU path (weights cast once in the wrapper, activations cast in-kernel,
              f32 accumulation and f32 elementwise tail).  Recommended on v5e/v6e/v7x.
    """
    B, N, H = input_vec.shape
    M = B * N
    tm = _choose_tile_m(M, tile_m)
    grid = (pl.cdiv(M, tm),)

    # Activations stay f32 in HBM (no extra cast pass); mask goes class-major (1, M).
    x2d = input_vec.reshape(M, H)
    if x2d.dtype != jnp.float32:
        x2d = x2d.astype(jnp.float32)
    m2d = node_mask.reshape(1, M).astype(jnp.float32)

    wdt = jnp.bfloat16 if use_bf16 else jnp.float32
    w1 = params["w1"].astype(wdt)                                       # (H, H), cast once
    b1 = params["b1"].reshape(1, H).astype(jnp.float32)
    w2p = jnp.zeros((H, _C_PAD), jnp.float32).at[:, :_C].set(params["w2"]).astype(wdt)
    b2p = jnp.zeros((1, _C_PAD), jnp.float32).at[:, :_C].set(params["b2"].reshape(1, _C))

    vmem_limit = _derive_vmem_limit(tm, H, 2 if use_bf16 else 4)

    def call(single_buffer_weights):
        def wspec(shape):
            # Grid-invariant operands: request a single VMEM buffer (halves weight footprint).
            if single_buffer_weights:
                return pl.BlockSpec(shape, lambda i: (0, 0), pipeline_mode=pl.Buffered(1))
            return pl.BlockSpec(shape, lambda i: (0, 0))

        return pl.pallas_call(
            _node_predictor_kernel,
            out_shape=jax.ShapeDtypeStruct((_C, M), jnp.float32),
            grid=grid,
            in_specs=[
                pl.BlockSpec((tm, H), lambda i: (i, 0)),      # x rows (ragged last block OK)
                pl.BlockSpec((1, tm), lambda i: (0, i)),      # mask (class-major row)
                wspec((H, H)),                                # W1
                wspec((1, H)),                                # b1
                wspec((H, _C_PAD)),                           # W2 (class-padded)
                wspec((1, _C_PAD)),                           # b2 (class-padded, zeros)
            ],
            out_specs=pl.BlockSpec((_C, tm), lambda i: (0, i)),   # lane-dense class-major
            compiler_params=pltpu.CompilerParams(
                dimension_semantics=("parallel",),
                vmem_limit_bytes=vmem_limit,
            ),
        )(x2d, m2d, w1, b1, w2p, b2p)

    try:
        out = call(True)
    except Exception:
        # Fallback for jax versions where pl.Buffered(1) on a top-level BlockSpec is not
        # supported; identical semantics, just default double-buffered weights.
        out = call(False)

    return out.T.reshape(B, N, _C)                       # (2, M) -> (M, 2) is a tiny copy


def init_params(key, hidden_size):
    """Deterministic PyTorch-Linear-style init (uniform +/- 1/sqrt(fan_in))."""
    k1, k2, k3, k4 = jax.random.split(key, 4)
    bound1 = 1.0 / math.sqrt(hidden_size)
    w1 = jax.random.uniform(k1, (hidden_size, hidden_size), jnp.float32, -bound1, bound1)
    b1 = jax.random.uniform(k2, (hidden_size,), jnp.float32, -bound1, bound1)
    w2 = jax.random.uniform(k3, (hidden_size, _C), jnp.float32, -bound1, bound1)
    b2 = jax.random.uniform(k4, (_C,), jnp.float32, -bound1, bound1)
    return {"w1": w1, "b1": b1, "w2": w2, "b2": b2}


def reference_forward(input_vec, node_mask, params):
    """Pure-JAX reference mirroring the PyTorch module literally."""
    m = node_mask[..., None].astype(jnp.float32)              # (B, N, 1)
    x = input_vec * m
    h = jnp.maximum(x @ params["w1"] + params["b1"], 0.0)
    logits = h @ params["w2"] + params["b2"]
    logits = logits + jnp.where(m > 0.0, 0.0, _MASK_LOG)      # log(mask + 1e-45) for 0/1 mask
    logp = jax.nn.log_softmax(logits, axis=-1)
    return logp * m


if __name__ == "__main__":
    # --- small shapes consistent with the module (single full block) --------------
    B, N, H = 2, 8, 32   # batch, num_nodes, hidden_size
    key = jax.random.PRNGKey(0)
    k_x, k_m, k_p = jax.random.split(key, 3)

    input_vec = jax.random.normal(k_x, (B, N, H), dtype=jnp.float32)
    node_mask = jax.random.bernoulli(k_m, p=0.7, shape=(B, N)).astype(jnp.float32)
    params = init_params(k_p, H)

    out = jax.block_until_ready(
        node_predictor_forward(input_vec, node_mask, params, use_bf16=False))
    ref = reference_forward(input_vec, node_mask, params)
    np.testing.assert_allclose(np.asarray(out), np.asarray(ref), rtol=1e-5, atol=1e-5)

    # --- larger shape exercising real tiling (multi-step ragged grid, f32) --------
    B2, N2, H2 = 4, 600, 128
    kx2, km2, kp2 = jax.random.split(jax.random.PRNGKey(1), 3)
    iv2 = jax.random.normal(kx2, (B2, N2, H2), dtype=jnp.float32)
    nm2 = jax.random.bernoulli(km2, p=0.7, shape=(B2, N2)).astype(jnp.float32)
    p2 = init_params(kp2, H2)

    out2 = jax.block_until_ready(
        node_predictor_forward(iv2, nm2, p2, tile_m=512, use_bf16=False))
    ref2 = reference_forward(iv2, nm2, p2)
    np.testing.assert_allclose(np.asarray(out2), np.asarray(ref2), rtol=1e-4, atol=1e-4)

    # --- default path: bf16 MXU (in-kernel activation cast), tile_m=1024 ----------
    out2_bf16 = jax.block_until_ready(node_predictor_forward(iv2, nm2, p2))
    assert np.all(np.isfinite(np.asarray(out2_bf16)))
    np.testing.assert_allclose(np.asarray(out2_bf16), np.asarray(ref2), rtol=0.05, atol=0.1)

    print("KERNEL_OK")
</pallas_src>

<mosaic_0001>
module attributes {stable_mosaic.version = 11 : i64} {
  func.func @_node_predictor_kernel(%arg0: i32, %arg1: memref<16x32xf32, #tpu.memory_space<vmem>>, %arg2: memref<1x16xf32, #tpu.memory_space<vmem>>, %arg3: memref<32x32xf32, #tpu.memory_space<vmem>>, %arg4: memref<1x32xf32, #tpu.memory_space<vmem>>, %arg5: memref<32x128xf32, #tpu.memory_space<vmem>>, %arg6: memref<1x128xf32, #tpu.memory_space<vmem>>, %arg7: memref<2x16xf32, #tpu.memory_space<vmem>>) attributes {dimension_semantics = [#tpu.dimension_semantics<parallel>], iteration_bounds = array<i64: 1>, scalar_prefetch = 0 : i64, scratch_operands = 0 : i64, tpu.core_type = #tpu.core_type<tc>, window_params = [{transform_indices = @transform_0, window_bounds = array<i64: 16, 32>}, {transform_indices = @transform_1, window_bounds = array<i64: 1, 16>}, {pipeline_mode = #tpu.pipeline_mode<synchronous>, transform_indices = @transform_2, window_bounds = array<i64: 32, 32>}, {pipeline_mode = #tpu.pipeline_mode<synchronous>, transform_indices = @transform_3, window_bounds = array<i64: 1, 32>}, {pipeline_mode = #tpu.pipeline_mode<synchronous>, transform_indices = @transform_4, window_bounds = array<i64: 32, 128>}, {pipeline_mode = #tpu.pipeline_mode<synchronous>, transform_indices = @transform_5, window_bounds = array<i64: 1, 128>}, {transform_indices = @transform_6, window_bounds = array<i64: 2, 16>}]} {
    %c0 = arith.constant 0 : index
    %c0_0 = arith.constant 0 : index
    %0 = vector.load %arg1[%c0, %c0_0] : memref<16x32xf32, #tpu.memory_space<vmem>>, vector<16x32xf32>
    %c0_1 = arith.constant 0 : index
    %c0_2 = arith.constant 0 : index
    %1 = vector.load %arg3[%c0_1, %c0_2] : memref<32x32xf32, #tpu.memory_space<vmem>>, vector<32x32xf32>
    %cst = arith.constant dense<0.000000e+00> : vector<16x32xf32>
    %2 = tpu.matmul %0, %1, %cst {dimension_numbers = #tpu.dot_dimension_numbers<[1], [0], [0], [1], [0, 0, 1, 1], [], []>} : vector<16x32xf32>, vector<32x32xf32>, vector<16x32xf32> -> vector<16x32xf32>
    %c0_3 = arith.constant 0 : index
    %c0_4 = arith.constant 0 : index
    %3 = vector.load %arg4[%c0_3, %c0_4] : memref<1x32xf32, #tpu.memory_space<vmem>>, vector<1x32xf32>
    %4 = vector.broadcast %3 : vector<1x32xf32> to vector<16x32xf32>
    %5 = arith.addf %2, %4 : vector<16x32xf32>
    %cst_5 = arith.constant 0.000000e+00 : f32
    %6 = vector.broadcast %cst_5 : f32 to vector<16x32xf32>
    %7 = arith.maximumf %5, %6 : vector<16x32xf32>
    %c0_6 = arith.constant 0 : index
    %c0_7 = arith.constant 0 : index
    %8 = vector.load %arg5[%c0_6, %c0_7] : memref<32x128xf32, #tpu.memory_space<vmem>>, vector<32x128xf32>
    %cst_8 = arith.constant dense<0.000000e+00> : vector<16x128xf32>
    %9 = tpu.matmul %7, %8, %cst_8 {dimension_numbers = #tpu.dot_dimension_numbers<[1], [0], [0], [1], [0, 0, 1, 1], [], []>} : vector<16x32xf32>, vector<32x128xf32>, vector<16x128xf32> -> vector<16x128xf32>
    %c0_9 = arith.constant 0 : index
    %c0_10 = arith.constant 0 : index
    %10 = vector.load %arg6[%c0_9, %c0_10] : memref<1x128xf32, #tpu.memory_space<vmem>>, vector<1x128xf32>
    %11 = vector.broadcast %10 : vector<1x128xf32> to vector<16x128xf32>
    %12 = arith.addf %9, %11 : vector<16x128xf32>
    %13 = tpu.transpose %12, [1, 0] : vector<16x128xf32> -> vector<128x16xf32>
    %14 = vector.extract_strided_slice %13 {offsets = [0, 0], sizes = [1, 16], strides = [1, 1]} : vector<128x16xf32> to vector<1x16xf32>
    %15 = vector.extract_strided_slice %13 {offsets = [1, 0], sizes = [1, 16], strides = [1, 1]} : vector<128x16xf32> to vector<1x16xf32>
    %16 = arith.maximumf %14, %15 : vector<1x16xf32>
    %17 = arith.subf %14, %15 : vector<1x16xf32>
    %18 = math.absf %17 : vector<1x16xf32>
    %cst_11 = arith.constant 0.000000e+00 : f32
    %19 = vector.broadcast %cst_11 : f32 to vector<1x16xf32>
    %20 = arith.subf %19, %18 : vector<1x16xf32>
    %21 = math.exp %20 : vector<1x16xf32>
    %cst_12 = arith.constant 1.000000e+00 : f32
    %22 = vector.broadcast %cst_12 : f32 to vector<1x16xf32>
    %23 = arith.addf %22, %21 : vector<1x16xf32>
    %24 = math.log %23 : vector<1x16xf32>
    %25 = arith.addf %16, %24 : vector<1x16xf32>
    %c0_13 = arith.constant 0 : index
    %c0_14 = arith.constant 0 : index
    %26 = vector.load %arg2[%c0_13, %c0_14] : memref<1x16xf32, #tpu.memory_space<vmem>>, vector<1x16xf32>
    %27 = vector.extract_strided_slice %13 {offsets = [0, 0], sizes = [2, 16], strides = [1, 1]} : vector<128x16xf32> to vector<2x16xf32>
    %28 = vector.broadcast %25 : vector<1x16xf32> to vector<2x16xf32>
    %29 = arith.subf %27, %28 : vector<2x16xf32>
    %30 = vector.broadcast %26 : vector<1x16xf32> to vector<2x16xf32>
    %31 = arith.mulf %29, %30 : vector<2x16xf32>
    %c0_15 = arith.constant 0 : index
    %c0_16 = arith.constant 0 : index
    %32 = vector.load %arg7[%c0_15, %c0_16] : memref<2x16xf32, #tpu.memory_space<vmem>>, vector<2x16xf32>
    tpu.vector_store %arg7[%c0_15, %c0_16], %31 {strides = array<i32>} : memref<2x16xf32, #tpu.memory_space<vmem>>, vector<2x16xf32>,
    return
  }
  func.func @transform_0(%arg0: i32) -> (i32, i32) {
    %c0_i32 = arith.constant 0 : i32
    %c0_i32_0 = arith.constant 0 : i32
    return %arg0, %c0_i32 : i32, i32
  }
  func.func @transform_1(%arg0: i32) -> (i32, i32) {
    %c0_i32 = arith.constant 0 : i32
    %c0_i32_0 = arith.constant 0 : i32
    return %c0_i32, %arg0 : i32, i32
  }
  func.func @transform_2(%arg0: i32) -> (i32, i32) {
    %c0_i32 = arith.constant 0 : i32
    %c0_i32_0 = arith.constant 0 : i32
    %c0_i32_1 = arith.constant 0 : i32
    return %c0_i32, %c0_i32_0 : i32, i32
  }
  func.func @transform_3(%arg0: i32) -> (i32, i32) {
    %c0_i32 = arith.constant 0 : i32
    %c0_i32_0 = arith.constant 0 : i32
    %c0_i32_1 = arith.constant 0 : i32
    return %c0_i32, %c0_i32_0 : i32, i32
  }
  func.func @transform_4(%arg0: i32) -> (i32, i32) {
    %c0_i32 = arith.constant 0 : i32
    %c0_i32_0 = arith.constant 0 : i32
    %c0_i32_1 = arith.constant 0 : i32
    return %c0_i32, %c0_i32_0 : i32, i32
  }
  func.func @transform_5(%arg0: i32) -> (i32, i32) {
    %c0_i32 = arith.constant 0 : i32
    %c0_i32_0 = arith.constant 0 : i32
    %c0_i32_1 = arith.constant 0 : i32
    return %c0_i32, %c0_i32_0 : i32, i32
  }
  func.func @transform_6(%arg0: i32) -> (i32, i32) {
    %c0_i32 = arith.constant 0 : i32
    %c0_i32_0 = arith.constant 0 : i32
    return %c0_i32, %arg0 : i32, i32
  }
}

module attributes {stable_mosaic.version = 11 : i64} {
  func.func @_node_predictor_kernel(%arg0: i32, %arg1: memref<16x32xf32, #tpu.memory_space<vmem>>, %arg2: memref<1x16xf32, #tpu.memory_space<vmem>>, %arg3: memref<32x32xf32, #tpu.memory_space<vmem>>, %arg4: memref<1x32xf32, #tpu.memory_space<vmem>>, %arg5: memref<32x128xf32, #tpu.memory_space<vmem>>, %arg6: memref<1x128xf32, #tpu.memory_space<vmem>>, %arg7: memref<2x16xf32, #tpu.memory_space<vmem>>) attributes {dimension_semantics = [#tpu.dimension_semantics<parallel>], iteration_bounds = array<i64: 1>, scalar_prefetch = 0 : i64, scratch_operands = 0 : i64, tpu.core_type = #tpu.core_type<tc>, window_params = [{transform_indices = @transform_0, window_bounds = array<i64: 16, 32>}, {transform_indices = @transform_1, window_bounds = array<i64: 1, 16>}, {pipeline_mode = #tpu.pipeline_mode<synchronous>, transform_indices = @transform_2, window_bounds = array<i64: 32, 32>}, {pipeline_mode = #tpu.pipeline_mode<synchronous>, transform_indices = @transform_3, window_bounds = array<i64: 1, 32>}, {pipeline_mode = #tpu.pipeline_mode<synchronous>, transform_indices = @transform_4, window_bounds = array<i64: 32, 128>}, {pipeline_mode = #tpu.pipeline_mode<synchronous>, transform_indices = @transform_5, window_bounds = array<i64: 1, 128>}, {transform_indices = @transform_6, window_bounds = array<i64: 2, 16>}]} {
    %c0 = arith.constant 0 : index
    %c0_0 = arith.constant 0 : index
    %0 = vector.load %arg1[%c0, %c0_0] : memref<16x32xf32, #tpu.memory_space<vmem>>, vector<16x32xf32>
    %c0_1 = arith.constant 0 : index
    %c0_2 = arith.constant 0 : index
    %1 = vector.load %arg3[%c0_1, %c0_2] : memref<32x32xf32, #tpu.memory_space<vmem>>, vector<32x32xf32>
    %cst = arith.constant dense<0.000000e+00> : vector<16x32xf32>
    %2 = tpu.matmul %0, %1, %cst {dimension_numbers = #tpu.dot_dimension_numbers<[1], [0], [0], [1], [0, 0, 1, 1], [], []>} : vector<16x32xf32>, vector<32x32xf32>, vector<16x32xf32> -> vector<16x32xf32>
    %c0_3 = arith.constant 0 : index
    %c0_4 = arith.constant 0 : index
    %3 = vector.load %arg4[%c0_3, %c0_4] : memref<1x32xf32, #tpu.memory_space<vmem>>, vector<1x32xf32>
    %4 = vector.broadcast %3 : vector<1x32xf32> to vector<16x32xf32>
    %5 = arith.addf %2, %4 : vector<16x32xf32>
    %cst_5 = arith.constant 0.000000e+00 : f32
    %6 = vector.broadcast %cst_5 : f32 to vector<16x32xf32>
    %7 = arith.maximumf %5, %6 : vector<16x32xf32>
    %c0_6 = arith.constant 0 : index
    %c0_7 = arith.constant 0 : index
    %8 = vector.load %arg5[%c0_6, %c0_7] : memref<32x128xf32, #tpu.memory_space<vmem>>, vector<32x128xf32>
    %cst_8 = arith.constant dense<0.000000e+00> : vector<16x128xf32>
    %9 = tpu.matmul %7, %8, %cst_8 {dimension_numbers = #tpu.dot_dimension_numbers<[1], [0], [0], [1], [0, 0, 1, 1], [], []>} : vector<16x32xf32>, vector<32x128xf32>, vector<16x128xf32> -> vector<16x128xf32>
    %c0_9 = arith.constant 0 : index
    %c0_10 = arith.constant 0 : index
    %10 = vector.load %arg6[%c0_9, %c0_10] : memref<1x128xf32, #tpu.memory_space<vmem>>, vector<1x128xf32>
    %11 = vector.broadcast %10 : vector<1x128xf32> to vector<16x128xf32>
    %12 = arith.addf %9, %11 : vector<16x128xf32>
    %13 = tpu.transpose %12, [1, 0] : vector<16x128xf32> -> vector<128x16xf32>
    %14 = vector.extract_strided_slice %13 {offsets = [0, 0], sizes = [1, 16], strides = [1, 1]} : vector<128x16xf32> to vector<1x16xf32>
    %15 = vector.extract_strided_slice %13 {offsets = [1, 0], sizes = [1, 16], strides = [1, 1]} : vector<128x16xf32> to vector<1x16xf32>
    %16 = arith.maximumf %14, %15 : vector<1x16xf32>
    %17 = arith.subf %14, %15 : vector<1x16xf32>
    %18 = math.absf %17 : vector<1x16xf32>
    %cst_11 = arith.constant 0.000000e+00 : f32
    %19 = vector.broadcast %cst_11 : f32 to vector<1x16xf32>
    %20 = arith.subf %19, %18 : vector<1x16xf32>
    %21 = math.exp %20 : vector<1x16xf32>
    %cst_12 = arith.constant 1.000000e+00 : f32
    %22 = vector.broadcast %cst_12 : f32 to vector<1x16xf32>
    %23 = arith.addf %22, %21 : vector<1x16xf32>
    %24 = math.log %23 : vector<1x16xf32>
    %25 = arith.addf %16, %24 : vector<1x16xf32>
    %c0_13 = arith.constant 0 : index
    %c0_14 = arith.constant 0 : index
    %26 = vector.load %arg2[%c0_13, %c0_14] : memref<1x16xf32, #tpu.memory_space<vmem>>, vector<1x16xf32>
    %27 = vector.extract_strided_slice %13 {offsets = [0, 0], sizes = [2, 16], strides = [1, 1]} : vector<128x16xf32> to vector<2x16xf32>
    %28 = vector.broadcast %25 : vector<1x16xf32> to vector<2x16xf32>
    %29 = arith.subf %27, %28 : vector<2x16xf32>
    %30 = vector.broadcast %26 : vector<1x16xf32> to vector<2x16xf32>
    %31 = arith.mulf %29, %30 : vector<2x16xf32>
    %c0_15 = arith.constant 0 : index
    %c0_16 = arith.constant 0 : index
    %32 = vector.load %arg7[%c0_15, %c0_16] : memref<2x16xf32, #tpu.memory_space<vmem>>, vector<2x16xf32>
    tpu.vector_store %arg7[%c0_15, %c0_16], %31 {strides = array<i32>} : memref<2x16xf32, #tpu.memory_space<vmem>>, vector<2x16xf32>,
    return
  }
  func.func @transform_0(%arg0: i32) -> (i32, i32) {
    %c0_i32 = arith.constant 0 : i32
    %c0_i32_0 = arith.constant 0 : i32
    return %arg0, %c0_i32 : i32, i32
  }
  func.func @transform_1(%arg0: i32) -> (i32, i32) {
    %c0_i32 = arith.constant 0 : i32
    %c0_i32_0 = arith.constant 0 : i32
    return %c0_i32, %arg0 : i32, i32
  }
  func.func @transform_2(%arg0: i32) -> (i32, i32) {
    %c0_i32 = arith.constant 0 : i32
    %c0_i32_0 = arith.constant 0 : i32
    %c0_i32_1 = arith.constant 0 : i32
    return %c0_i32, %c0_i32_0 : i32, i32
  }
  func.func @transform_3(%arg0: i32) -> (i32, i32) {
    %c0_i32 = arith.constant 0 : i32
    %c0_i32_0 = arith.constant 0 : i32
    %c0_i32_1 = arith.constant 0 : i32
    return %c0_i32, %c0_i32_0 : i32, i32
  }
  func.func @transform_4(%arg0: i32) -> (i32, i32) {
    %c0_i32 = arith.constant 0 : i32
    %c0_i32_0 = arith.constant 0 : i32
    %c0_i32_1 = arith.constant 0 : i32
    return %c0_i32, %c0_i32_0 : i32, i32
  }
  func.func @transform_5(%arg0: i32) -> (i32, i32) {
    %c0_i32 = arith.constant 0 : i32
    %c0_i32_0 = arith.constant 0 : i32
    %c0_i32_1 = arith.constant 0 : i32
    return %c0_i32, %c0_i32_0 : i32, i32
  }
  func.func @transform_6(%arg0: i32) -> (i32, i32) {
    %c0_i32 = arith.constant 0 : i32
    %c0_i32_0 = arith.constant 0 : i32
    return %c0_i32, %arg0 : i32, i32
  }
}

</mosaic_0001>

<bundles_post_ra>
// kernel: tpu_custom_call.1
= control target key start
LH: loop header
LB: loop body
LE: loop exit
PB: predicated region body
PF: predicated region fallthrough
CT: control target
= control target key end

     0   :  { %11 = vsyncpa [#allocation3], 0  ;;  %s459_s0 = inlined_call_operand.hbm [shape: f32[16,32], index: 0, kind: input, shape index: {}]   ;;  %s460_s1 = inlined_call_operand.hbm [shape: f32[1,16], index: 1, kind: input, shape index: {}]   ;;  %s461_s2 = inlined_call_operand.hbm [shape: f32[32,32], index: 2, kind: input, shape index: {}]   ;;  %s462_s3 = inlined_call_operand.vmem [shape: f32[1,32], index: 3, kind: input, shape index: {}]   ;;  %s463_s4 = inlined_call_operand.hbm [shape: f32[32,128], index: 4, kind: input, shape index: {}]   ;;  %s464_s5 = inlined_call_operand.vmem [shape: f32[1,128], index: 5, kind: input, shape index: {}]   ;;  %s465_s6 = inlined_call_operand.hbm [shape: f32[2,16], index: 6, kind: output, shape index: {}]  }
   0x1   :  { %12 = vsyncpa [#allocation6], 0 }
   0x2   :  { %13 = vsyncpa [#allocation9], 0  ;;  %s33_s23 = sshll.u32 %s460_s1, 4  ;;  %s34_s23 = int_to_ptr.hbm [resolvable:$true] %s33_s23 }
   0x3   :  { %14 = vsyncpa [#allocation4], 0  ;;  %s392_s24 = smov [#allocation5]   ;;  %s19_s28 = sshll.u32 %s459_s0, 4  ;;  %s20_s28 = int_to_ptr.hbm [resolvable:$true] %s19_s28 }
   0x4   :  { %s35_s25 = sshll.u32 %s392_s24, 4  ;;  %s393_s29 = smov [#allocation2]   ;;  %s36_s25 = int_to_ptr.vmem [resolvable:$true] %s35_s25 }
   0x5   :  { %38 = dma.hbm_to_vmem [thread:$0]  %s34_s23, 16, %s36_s25, [#allocation6]  }
   0x6   :  { %s21_s30 = sshll.u32 %s393_s29, 4  ;;  %s394_s7 = smov 128   ;;  %s22_s30 = int_to_ptr.vmem [resolvable:$true] %s21_s30 }
   0x7   :  { %s395_s8 = smov 8   ;;  %s43_s1 = sshll.u32 %s461_s2, 4  ;;  %s44_s1 = int_to_ptr.hbm [resolvable:$true] %s43_s1 }
   0x8   :  { %27 = dma.hbm_to_vmem [thread:$0]  %s20_s28, 256, %s22_s30, [#allocation3], %s394_s7, %s394_s7, %s395_s8  }
   0x9   :  { %s396_s11 = smov [#allocation7]   ;;  %s58_s0 = sshll.u32 %s463_s4, 4  ;;  %s59_s0 = int_to_ptr.hbm [resolvable:$true] %s58_s0 }
   0xa   :  { %s45_s12 = sshll.u32 %s396_s11, 4  ;;  %s397_s15 = smov [#allocation8]   ;;  %s46_s12 = int_to_ptr.vmem [resolvable:$true] %s45_s12 }
   0xb   :  { %51 = dma.hbm_to_vmem [thread:$0]  %s44_s1, 512, %s46_s12, [#allocation6], %s394_s7, %s394_s7, %s395_s8  }
   0xc   :  { %s60_s16 = sshll.u32 %s397_s15, 4  ;;  %s61_s16 = int_to_ptr.vmem [resolvable:$true] %s60_s16 }
   0xd   :  { %66 = dma.hbm_to_vmem [thread:$0]  %s59_s0, 512, %s61_s16, [#allocation9], %s394_s7, %s394_s7, %s395_s8  }
   0xe   :  { %384 = dma.done.wait [#allocation3], 256  }
   0xf   :  { %385 = vsyncadd [#allocation3], 4294967040 }
  0x10   :  { %386 = dma.done.wait [#allocation6], 528  }
  0x11   :  { %387 = vsyncadd [#allocation6], 4294966768 }
  0x12   :  { %388 = dma.done.wait [#allocation9], 512  }
  0x13   :  { %389 = vsyncadd [#allocation9], 4294966784  ;;  %v90_v0 = vld [vmem:[#allocation7 + $0x18] sm:$0xff]  ;;  %v89_v1 = vld [vmem:[#allocation7 + $0x10] sm:$0xff]  ;;  %vm95_vm0 = vcmask 261120   ;;  %s225_s21 = sshll.u32 %s465_s6, 4  ;;  %s226_s21 = int_to_ptr.hbm [resolvable:$true] %s225_s21 }
  0x14   :  { %241 = vmatpush.msra.mxu2 %v90_v0  ;;  %114 = vmatpush.msra.mxu0 %v90_v0  ;;  %v88_v2 = vld [vmem:[#allocation7 + $0x8] sm:$0xff]  ;;  %v130_v3 = vld [vmem:[#allocation8 + $0x18] sm:$0xff]  ;;  %v87_v4 = vld [vmem:[#allocation7] sm:$0xff]  ;;  %vm216_vm1 = vcmask 123904  }
  0x15   :  { %153 = vmatpush.msra.mxu1 %v130_v3  ;;  %245 = vmatpush.msra.mxu3 %v130_v3  ;;  %v86_v5 = vld [vmem:[#allocation2 + $0x8] sm:$0xff]  ;;  %v85_v6 = vld [vmem:[#allocation2] sm:$0xff]  ;;  %v127_v9 = vld [vmem:[#allocation8] sm:$0xff] }
  0x16   :  { %242 = vmatpush.msra.mxu2 %v89_v1  ;;  %115 = vmatpush.msra.mxu0 %v89_v1  ;;  %v129_v7 = vld [vmem:[#allocation8 + $0x10] sm:$0xff]  ;;  %v128_v8 = vld [vmem:[#allocation8 + $0x8] sm:$0xff]  ;;  %v259_v34 = vld [vmem:[#allocation5] ss:$0 sm:$0xff] }
  0x17   :  { %154 = vmatpush.msra.mxu1 %v129_v7  ;;  %246 = vmatpush.msra.mxu3 %v129_v7  ;;  %v257_v10 = vld [vmem:[%s462_s3] ss:$0 sm:$0xff]  ;;  %s398_s3 = smov [#allocation10]  }
  0x18   :  { %243 = vmatpush.msra.mxu2 %v88_v2  ;;  %116 = vmatpush.msra.mxu0 %v88_v2  ;;  %v258_v17 = vld [vmem:[%s464_s5] ss:$0 sm:$0xff]  ;;  %s223_s5 = sshll.u32 %s398_s3, 4  ;;  %s224_s5 = int_to_ptr.vmem [resolvable:$true] %s223_s5 }
  0x19   :  { %155 = vmatpush.msra.mxu1 %v128_v8  ;;  %247 = vmatpush.msra.mxu3 %v128_v8 }
  0x1a   :  { %244 = vmatpush.msra.mxu2 %v87_v4  ;;  %117 = vmatpush.msra.mxu0 %v87_v4 }
  0x1b   :  { %238 = vmatmul.msk.f32.vlgmr.msra.gmra.mxu2 %vm95_vm0, %v86_v5  ;;  %237 = vmatmul.msk.f32.vlgmr.msra.gmra.mxu0 %vm95_vm0, %v85_v6 }
  0x1c   :  { %156 = vmatpush.msra.mxu1 %v127_v9  ;;  %248 = vmatpush.msra.mxu3 %v127_v9 }
  0x98   :  { %v119_v11 = vpop.f32.mrf.mxu0 }
  0x99   :  { %v120_v12 = vadd.f32 %v257_v10, %v119_v11 }
  0x9b   :  { %v125_v13 = vmax.f32 %v120_v12, 0.0 }
  0x9d   :  { %239 = vmatmul.msk.f32.vlgmr.msra.gmra.mxu1 %vm95_vm0, %v125_v13 }
  0x9e   :  { %v122_v14 = vpop.f32.mrf.mxu2 }
  0x9f   :  { %v123_v15 = vadd.f32 %v257_v10, %v122_v14 }
  0xa1   :  { %v126_v16 = vmax.f32 %v123_v15, 0.0 }
  0xa3   :  { %240 = vmatmul.msk.f32.vlgmr.msra.gmra.mxu3 %vm95_vm0, %v126_v16 }
 0x11a   :  { %v158_v18 = vpop.f32.mrf.mxu1 }
 0x11b   :  { %v159_v19 = vadd.f32 %v258_v17, %v158_v18 }
 0x11d   :  { %164 = vxpose.xlu0.b32.start [1/2] (short) (narrow) %v159_v19, 8 }
 0x126   :  { %v161_v20 = vpop.f32.mrf.mxu3 }
 0x127   :  { %v162_v21 = vadd.f32 %v258_v17, %v161_v20 }
 0x129   :  { %165 = vxpose.xlu0.b32.end [2/2] (short) (narrow) %v162_v21, 8 }
 0x1c5   :  { %v180_v22 = vpop.trf.xlu0 }
 0x1c6   :  { %v197_v23 = vrot.slane %v180_v22, 1 }
 0x1c8   :  { %v200_v24 = vsub.f32 %v180_v22, %v197_v23  ;;  %v199_v31 = vmax.f32 %v180_v22, %v197_v23 }
 0x1ca   :  { %v201_v25 = vand.u32 2147483647, %v200_v24 }
 0x1cc   :  { %v202_v26 = vsub.f32 0.0, %v201_v25 }
 0x1ce   :  { %v203_v27 = vmul.f32 1.442695, %v202_v26 }
 0x1d0   :  { %260 = vpow2.f32 %v203_v27 }
 0x1d6   :  { %v261_v28 = vpop.eup %260 }
 0x1d7   :  { %v205_v29 = vadd.f32 1.0, %v261_v28 }
 0x1d9   :  { %262 = vlog2.f32 %v205_v29 }
 0x1df   :  { %v263_v30 = vpop.eup %262 }
 0x1e0   :  { %v207_v32 = vmul.f32 0.6931472, %v263_v30 }
 0x1e2   :  { %v208_v33 = vadd.f32 %v207_v32, %v199_v31 }
 0x1e4   :  { %v210_v35 = vperm.slane %v208_v33, 0 }
 0x1e6   :  { %v211_v36 = vsub.f32 %v180_v22, %v210_v35 }
 0x1e8   :  { %v215_v37 = vmul.f32 %v259_v34, %v211_v36 }
 0x1ea   :  { %217 = vst.msk [vmem:[#allocation10] sm:$0x3] %vm216_vm1, %v215_v37 }
 0x1eb   :  { %228 = dma.vmem_to_hbm [thread:$0]  %s224_s5, 32, %s226_s21, [#allocation4]  }
 0x1ec   :  { %390 = dma.done.wait [#allocation4], 32  }
 0x1ed   :  { %391 = vsyncadd [#allocation4], 4294967264 }
 0x1ee   :  { %233 = vsyncpa [#allocation3], 1 }
 0x1ef   :  { %234 = vsyncpa [#allocation6], 1 }
 0x1f0   :  { %235 = vsyncpa [#allocation9], 1 }
 0x1f1   :  { %236 = vsyncpa [#allocation4], 1 }

// kernel: tpu_custom_call.1
= control target key start
LH: loop header
LB: loop body
LE: loop exit
PB: predicated region body
PF: predicated region fallthrough
CT: control target
= control target key end

     0   :  { %11 = vsyncpa [#allocation3], 0  ;;  %s459_s0 = inlined_call_operand.hbm [shape: f32[16,32], index: 0, kind: input, shape index: {}]   ;;  %s460_s1 = inlined_call_operand.hbm [shape: f32[1,16], index: 1, kind: input, shape index: {}]   ;;  %s461_s2 = inlined_call_operand.hbm [shape: f32[32,32], index: 2, kind: input, shape index: {}]   ;;  %s462_s3 = inlined_call_operand.vmem [shape: f32[1,32], index: 3, kind: input, shape index: {}]   ;;  %s463_s4 = inlined_call_operand.hbm [shape: f32[32,128], index: 4, kind: input, shape index: {}]   ;;  %s464_s5 = inlined_call_operand.vmem [shape: f32[1,128], index: 5, kind: input, shape index: {}]   ;;  %s465_s6 = inlined_call_operand.hbm [shape: f32[2,16], index: 6, kind: output, shape index: {}]  }
   0x1   :  { %12 = vsyncpa [#allocation6], 0 }
   0x2   :  { %13 = vsyncpa [#allocation9], 0  ;;  %s33_s23 = sshll.u32 %s460_s1, 4  ;;  %s34_s23 = int_to_ptr.hbm [resolvable:$true] %s33_s23 }
   0x3   :  { %14 = vsyncpa [#allocation4], 0  ;;  %s392_s24 = smov [#allocation5]   ;;  %s19_s28 = sshll.u32 %s459_s0, 4  ;;  %s20_s28 = int_to_ptr.hbm [resolvable:$true] %s19_s28 }
   0x4   :  { %s35_s25 = sshll.u32 %s392_s24, 4  ;;  %s393_s29 = smov [#allocation2]   ;;  %s36_s25 = int_to_ptr.vmem [resolvable:$true] %s35_s25 }
   0x5   :  { %38 = dma.hbm_to_vmem [thread:$0]  %s34_s23, 16, %s36_s25, [#allocation6]  }
   0x6   :  { %s21_s30 = sshll.u32 %s393_s29, 4  ;;  %s394_s7 = smov 128   ;;  %s22_s30 = int_to_ptr.vmem [resolvable:$true] %s21_s30 }
   0x7   :  { %s395_s8 = smov 8   ;;  %s43_s1 = sshll.u32 %s461_s2, 4  ;;  %s44_s1 = int_to_ptr.hbm [resolvable:$true] %s43_s1 }
   0x8   :  { %27 = dma.hbm_to_vmem [thread:$0]  %s20_s28, 256, %s22_s30, [#allocation3], %s394_s7, %s394_s7, %s395_s8  }
   0x9   :  { %s396_s11 = smov [#allocation7]   ;;  %s58_s0 = sshll.u32 %s463_s4, 4  ;;  %s59_s0 = int_to_ptr.hbm [resolvable:$true] %s58_s0 }
   0xa   :  { %s45_s12 = sshll.u32 %s396_s11, 4  ;;  %s397_s15 = smov [#allocation8]   ;;  %s46_s12 = int_to_ptr.vmem [resolvable:$true] %s45_s12 }
   0xb   :  { %51 = dma.hbm_to_vmem [thread:$0]  %s44_s1, 512, %s46_s12, [#allocation6], %s394_s7, %s394_s7, %s395_s8  }
   0xc   :  { %s60_s16 = sshll.u32 %s397_s15, 4  ;;  %s61_s16 = int_to_ptr.vmem [resolvable:$true] %s60_s16 }
   0xd   :  { %66 = dma.hbm_to_vmem [thread:$0]  %s59_s0, 512, %s61_s16, [#allocation9], %s394_s7, %s394_s7, %s395_s8  }
   0xe   :  { %384 = dma.done.wait [#allocation3], 256  }
   0xf   :  { %385 = vsyncadd [#allocation3], 4294967040 }
  0x10   :  { %386 = dma.done.wait [#allocation6], 528  }
  0x11   :  { %387 = vsyncadd [#allocation6], 4294966768 }
  0x12   :  { %388 = dma.done.wait [#allocation9], 512  }
  0x13   :  { %389 = vsyncadd [#allocation9], 4294966784  ;;  %v90_v0 = vld [vmem:[#allocation7 + $0x18] sm:$0xff]  ;;  %v89_v1 = vld [vmem:[#allocation7 + $0x10] sm:$0xff]  ;;  %vm95_vm0 = vcmask 261120   ;;  %s225_s21 = sshll.u32 %s465_s6, 4  ;;  %s226_s21 = int_to_ptr.hbm [resolvable:$true] %s225_s21 }
  0x14   :  { %241 = vmatpush.msra.mxu2 %v90_v0  ;;  %114 = vmatpush.msra.mxu0 %v90_v0  ;;  %v88_v2 = vld [vmem:[#allocation7 + $0x8] sm:$0xff]  ;;  %v130_v3 = vld [vmem:[#allocation8 + $0x18] sm:$0xff]  ;;  %v87_v4 = vld [vmem:[#allocation7] sm:$0xff]  ;;  %vm216_vm1 = vcmask 123904  }
  0x15   :  { %153 = vmatpush.msra.mxu1 %v130_v3  ;;  %245 = vmatpush.msra.mxu3 %v130_v3  ;;  %v86_v5 = vld [vmem:[#allocation2 + $0x8] sm:$0xff]  ;;  %v85_v6 = vld [vmem:[#allocation2] sm:$0xff]  ;;  %v127_v9 = vld [vmem:[#allocation8] sm:$0xff] }
  0x16   :  { %242 = vmatpush.msra.mxu2 %v89_v1  ;;  %115 = vmatpush.msra.mxu0 %v89_v1  ;;  %v129_v7 = vld [vmem:[#allocation8 + $0x10] sm:$0xff]  ;;  %v128_v8 = vld [vmem:[#allocation8 + $0x8] sm:$0xff]  ;;  %v259_v34 = vld [vmem:[#allocation5] ss:$0 sm:$0xff] }
  0x17   :  { %154 = vmatpush.msra.mxu1 %v129_v7  ;;  %246 = vmatpush.msra.mxu3 %v129_v7  ;;  %v257_v10 = vld [vmem:[%s462_s3] ss:$0 sm:$0xff]  ;;  %s398_s3 = smov [#allocation10]  }
  0x18   :  { %243 = vmatpush.msra.mxu2 %v88_v2  ;;  %116 = vmatpush.msra.mxu0 %v88_v2  ;;  %v258_v17 = vld [vmem:[%s464_s5] ss:$0 sm:$0xff]  ;;  %s223_s5 = sshll.u32 %s398_s3, 4  ;;  %s224_s5 = int_to_ptr.vmem [resolvable:$true] %s223_s5 }
  0x19   :  { %155 = vmatpush.msra.mxu1 %v128_v8  ;;  %247 = vmatpush.msra.mxu3 %v128_v8 }
  0x1a   :  { %244 = vmatpush.msra.mxu2 %v87_v4  ;;  %117 = vmatpush.msra.mxu0 %v87_v4 }
  0x1b   :  { %238 = vmatmul.msk.f32.vlgmr.msra.gmra.mxu2 %vm95_vm0, %v86_v5  ;;  %237 = vmatmul.msk.f32.vlgmr.msra.gmra.mxu0 %vm95_vm0, %v85_v6 }
  0x1c   :  { %156 = vmatpush.msra.mxu1 %v127_v9  ;;  %248 = vmatpush.msra.mxu3 %v127_v9 }
  0x98   :  { %v119_v11 = vpop.f32.mrf.mxu0 }
  0x99   :  { %v120_v12 = vadd.f32 %v257_v10, %v119_v11 }
  0x9b   :  { %v125_v13 = vmax.f32 %v120_v12, 0.0 }
  0x9d   :  { %239 = vmatmul.msk.f32.vlgmr.msra.gmra.mxu1 %vm95_vm0, %v125_v13 }
  0x9e   :  { %v122_v14 = vpop.f32.mrf.mxu2 }
  0x9f   :  { %v123_v15 = vadd.f32 %v257_v10, %v122_v14 }
  0xa1   :  { %v126_v16 = vmax.f32 %v123_v15, 0.0 }
  0xa3   :  { %240 = vmatmul.msk.f32.vlgmr.msra.gmra.mxu3 %vm95_vm0, %v126_v16 }
 0x11a   :  { %v158_v18 = vpop.f32.mrf.mxu1 }
 0x11b   :  { %v159_v19 = vadd.f32 %v258_v17, %v158_v18 }
 0x11d   :  { %164 = vxpose.xlu0.b32.start [1/2] (short) (narrow) %v159_v19, 8 }
 0x126   :  { %v161_v20 = vpop.f32.mrf.mxu3 }
 0x127   :  { %v162_v21 = vadd.f32 %v258_v17, %v161_v20 }
 0x129   :  { %165 = vxpose.xlu0.b32.end [2/2] (short) (narrow) %v162_v21, 8 }
 0x1c5   :  { %v180_v22 = vpop.trf.xlu0 }
 0x1c6   :  { %v197_v23 = vrot.slane %v180_v22, 1 }
 0x1c8   :  { %v200_v24 = vsub.f32 %v180_v22, %v197_v23  ;;  %v199_v31 = vmax.f32 %v180_v22, %v197_v23 }
 0x1ca   :  { %v201_v25 = vand.u32 2147483647, %v200_v24 }
 0x1cc   :  { %v202_v26 = vsub.f32 0.0, %v201_v25 }
 0x1ce   :  { %v203_v27 = vmul.f32 1.442695, %v202_v26 }
 0x1d0   :  { %260 = vpow2.f32 %v203_v27 }
 0x1d6   :  { %v261_v28 = vpop.eup %260 }
 0x1d7   :  { %v205_v29 = vadd.f32 1.0, %v261_v28 }
 0x1d9   :  { %262 = vlog2.f32 %v205_v29 }
 0x1df   :  { %v263_v30 = vpop.eup %262 }
 0x1e0   :  { %v207_v32 = vmul.f32 0.6931472, %v263_v30 }
 0x1e2   :  { %v208_v33 = vadd.f32 %v207_v32, %v199_v31 }
 0x1e4   :  { %v210_v35 = vperm.slane %v208_v33, 0 }
 0x1e6   :  { %v211_v36 = vsub.f32 %v180_v22, %v210_v35 }
 0x1e8   :  { %v215_v37 = vmul.f32 %v259_v34, %v211_v36 }
 0x1ea   :  { %217 = vst.msk [vmem:[#allocation10] sm:$0x3] %vm216_vm1, %v215_v37 }
 0x1eb   :  { %228 = dma.vmem_to_hbm [thread:$0]  %s224_s5, 32, %s226_s21, [#allocation4]  }
 0x1ec   :  { %390 = dma.done.wait [#allocation4], 32  }
 0x1ed   :  { %391 = vsyncadd [#allocation4], 4294967264 }
 0x1ee   :  { %233 = vsyncpa [#allocation3], 1 }
 0x1ef   :  { %234 = vsyncpa [#allocation6], 1 }
 0x1f0   :  { %235 = vsyncpa [#allocation9], 1 }
 0x1f1   :  { %236 = vsyncpa [#allocation4], 1 }

</bundles_post_ra>
